<compile_context>
chip_gen: v7x
topology: tpu7x:2x2x1
jax: 0.10.0
libtpu: 0.0.40
codegen_flags: <defaults>
</compile_context>

<pallas_src>
import functools

import jax
import jax.numpy as jnp
from jax import lax
from jax.experimental import pallas as pl
from jax.experimental.pallas import tpu as pltpu

LANE = 128


def _focal_kernel(alpha, gamma, n_valid_rows_last, logits_ref, targets_ref,
                  out_ref):
    i = pl.program_id(0)
    last = pl.num_programs(0) - 1

    x = logits_ref[...].astype(jnp.float32)
    t = targets_ref[...].astype(jnp.float32)

    # e = exp(-|x|) is reused for both the numerically-stable BCE and the
    # sigmoid: 2 EUP transcendentals (exp, log1p) + 1 EUP approx reciprocal.
    e = jnp.exp(-jnp.abs(x))
    bce = jnp.maximum(x, 0.0) - x * t + jnp.log1p(e)

    # sigmoid(x) = 1/(1+e) if x >= 0 else e/(1+e); divide goes to the EUP.
    inv_1pe = pl.reciprocal(1.0 + e, approx=True)
    probs = jnp.where(x >= 0.0, inv_1pe, e * inv_1pe)

    # 1 - p_t = t + probs - 2*t*probs   (p_t never materialized)
    tp = t * probs
    one_m_pt = (t + probs) - (tp + tp)

    g = float(gamma)
    if g == 2.0:
        mod = one_m_pt * one_m_pt                 # square, not generic pow
    elif g == float(int(g)) and 1 <= int(g) <= 4:
        mod = one_m_pt
        for _ in range(int(g) - 1):
            mod = mod * one_m_pt
    else:
        mod = one_m_pt ** g

    # alpha_w = t*alpha + (1-t)*(1-alpha) = (1-alpha) + t*(2*alpha - 1)
    alpha_w = (1.0 - alpha) + t * (2.0 * alpha - 1.0)
    focal = alpha_w * mod * bce

    tr, tc = focal.shape

    def partial_sum(f):
        # (tr, tc) -> (8, tc) lane-dense partial via a 2-level tree of vreg
        # adds (independent chains instead of one serial chain).
        k = tr // 8
        gsplit = 1
        for cand in (8, 4, 2):
            if k % cand == 0:
                gsplit = cand
                break
        if gsplit > 1:
            return f.reshape(gsplit, k // gsplit, 8, tc).sum(axis=1).sum(axis=0)
        return f.reshape(k, 8, tc).sum(axis=0)

    if n_valid_rows_last < tr:
        # Only the ragged last block needs masking (its overhang rows are
        # undefined -> must use select, never a 0/1 multiply).
        @pl.when(i != last)
        def _():
            out_ref[...] = partial_sum(focal)

        @pl.when(i == last)
        def _():
            row = lax.broadcasted_iota(jnp.int32, (tr, tc), 0)
            out_ref[...] = partial_sum(
                jnp.where(row < n_valid_rows_last, focal, 0.0))
    else:
        out_ref[...] = partial_sum(focal)


def _sublane_multiple(dtype):
    # (8, 128) tile for 4-byte dtypes; sub-32-bit dtypes pack along sublanes.
    return {4: 8, 2: 16, 1: 32}.get(jnp.dtype(dtype).itemsize, 8)


def _round_up(x, m):
    return -(-x // m) * m


def _pick_tile_and_vmem():
    """Per-generation row-tile cap and scoped-VMEM limit."""
    try:
        vmem_bytes = int(pltpu.get_tpu_info().vmem_capacity_bytes)
    except Exception:
        return 2048, 32 * 1024 * 1024          # conservative, fits everywhere
    if vmem_bytes >= 100 * 1024 * 1024:
        return 4096, 64 * 1024 * 1024          # v5e / v6e: 128 MiB VMEM
    return 2048, 40 * 1024 * 1024              # v7x: 64 MiB per TensorCore


def _focal_elementwise_jnp(x, t, alpha, gamma):
    # Plain-JAX per-element focal loss, used only for the <128-element tail.
    x = x.astype(jnp.float32)
    t = t.astype(jnp.float32)
    probs = jax.nn.sigmoid(x)
    bce = jnp.maximum(x, 0.0) - x * t + jnp.log1p(jnp.exp(-jnp.abs(x)))
    p_t = t * probs + (1.0 - t) * (1.0 - probs)
    mod = (1.0 - p_t) ** gamma
    aw = t * alpha + (1.0 - t) * (1.0 - alpha)
    return aw * mod * bce


def focal_loss(logits, targets, alpha=0.25, gamma=2.0):
    """Sigmoid focal loss, mean over all elements (matches FocalLoss.forward)."""
    assert logits.shape == targets.shape
    n = int(logits.size)
    if n == 0:
        return jnp.array(jnp.nan, jnp.float32)  # torch mean of empty -> nan

    # Keep native dtypes in HBM (no wrapper-side f32 upcast); cast in-kernel.
    flat_l = logits.reshape(-1)
    flat_t = targets.reshape(-1)

    rem = n % LANE
    aligned = n - rem
    total = jnp.float32(0.0)

    if aligned:
        # Free reshape to a lane-dense (rows, 128) slab; no padding copy.
        main_l = flat_l if rem == 0 else lax.slice(flat_l, (0,), (aligned,))
        main_t = flat_t if rem == 0 else lax.slice(flat_t, (0,), (aligned,))
        rows = aligned // LANE
        l2 = main_l.reshape(rows, LANE)
        t2 = main_t.reshape(rows, LANE)

        sub = max(_sublane_multiple(l2.dtype), _sublane_multiple(t2.dtype))
        max_tile_r, vmem_limit = _pick_tile_and_vmem()

        tile_r = min(max_tile_r, _round_up(rows, sub))
        # Ensure >= 2 grid steps when possible so both v7x TensorCores get
        # work (one extra ~0.35us step is noise on v5e/v6e).
        if rows > sub and -(-rows // tile_r) < 2:
            tile_r = max(sub, _round_up(-(-rows // 2), sub))

        grid = -(-rows // tile_r)
        n_valid_rows_last = rows - (grid - 1) * tile_r  # static Python int

        kernel = functools.partial(
            _focal_kernel, float(alpha), float(gamma), int(n_valid_rows_last))

        partials = pl.pallas_call(
            kernel,
            out_shape=jax.ShapeDtypeStruct((grid * 8, LANE), jnp.float32),
            grid=(grid,),
            in_specs=[
                pl.BlockSpec((tile_r, LANE), lambda i: (i, 0)),
                pl.BlockSpec((tile_r, LANE), lambda i: (i, 0)),
            ],
            out_specs=pl.BlockSpec((8, LANE), lambda i: (i, 0)),
            compiler_params=pltpu.CompilerParams(
                dimension_semantics=("parallel",),
                vmem_limit_bytes=vmem_limit,
            ),
        )(l2, t2)
        total = total + jnp.sum(partials)

    if rem:
        # Sub-128 ragged tail: negligible work, done in plain JAX (avoids any
        # full-array pad copy for unaligned sizes).
        tail_l = lax.slice(flat_l, (aligned,), (n,))
        tail_t = lax.slice(flat_t, (aligned,), (n,))
        total = total + jnp.sum(_focal_elementwise_jnp(tail_l, tail_t,
                                                       alpha, gamma))

    return total / jnp.float32(n)


def focal_loss_ref(logits, targets, alpha=0.25, gamma=2.0):
    x = logits.astype(jnp.float32)
    t = targets.astype(jnp.float32)
    probs = jax.nn.sigmoid(x)
    bce = jnp.maximum(x, 0.0) - x * t + jnp.log1p(jnp.exp(-jnp.abs(x)))
    p_t = t * probs + (1 - t) * (1 - probs)
    mod = (1.0 - p_t) ** gamma
    aw = t * alpha + (1 - t) * (1 - alpha)
    return jnp.mean(aw * mod * bce)


if __name__ == "__main__":
    key = jax.random.PRNGKey(0)
    k1, k2 = jax.random.split(key)

    # Small NCHW-shaped inputs, consistent with a dense-prediction focal loss.
    B, C, H, W = 2, 4, 16, 16
    logits = jax.random.normal(k1, (B, C, H, W), dtype=jnp.float32) * 2.0
    targets = (jax.random.uniform(k2, (B, C, H, W)) > 0.7).astype(jnp.float32)

    loss = focal_loss(logits, targets, alpha=0.25, gamma=2.0)
    loss = jax.block_until_ready(loss)

    ref = focal_loss_ref(logits, targets, alpha=0.25, gamma=2.0)
    # rtol loosened slightly: approx reciprocal (EUP vrcp) has ~1e-4 per-element
    # relative error which mostly averages out in the mean.
    assert jnp.allclose(loss, ref, rtol=1e-3, atol=1e-6), (loss, ref)

    print("KERNEL_OK")
</pallas_src>

<mosaic_0001>
module attributes {stable_mosaic.version = 11 : i64} {
  func.func @_focal_kernel(%arg0: i32, %arg1: memref<8x128xf32, #tpu.memory_space<vmem>>, %arg2: memref<8x128xf32, #tpu.memory_space<vmem>>, %arg3: memref<8x128xf32, #tpu.memory_space<vmem>>) attributes {dimension_semantics = [#tpu.dimension_semantics<parallel>], iteration_bounds = array<i64: 2>, scalar_prefetch = 0 : i64, scratch_operands = 0 : i64, tpu.core_type = #tpu.core_type<tc>, window_params = [{transform_indices = @transform_0, window_bounds = array<i64: 8, 128>}, {transform_indices = @transform_1, window_bounds = array<i64: 8, 128>}, {transform_indices = @transform_2, window_bounds = array<i64: 8, 128>}]} {
    %c0 = arith.constant 0 : index
    %c0_0 = arith.constant 0 : index
    %0 = vector.load %arg1[%c0, %c0_0] : memref<8x128xf32, #tpu.memory_space<vmem>>, vector<8x128xf32>
    %c0_1 = arith.constant 0 : index
    %c0_2 = arith.constant 0 : index
    %1 = vector.load %arg2[%c0_1, %c0_2] : memref<8x128xf32, #tpu.memory_space<vmem>>, vector<8x128xf32>
    %2 = math.absf %0 : vector<8x128xf32>
    %cst = arith.constant 0.000000e+00 : f32
    %3 = vector.broadcast %cst : f32 to vector<8x128xf32>
    %4 = arith.subf %3, %2 : vector<8x128xf32>
    %5 = math.exp %4 : vector<8x128xf32>
    %cst_3 = arith.constant 0.000000e+00 : f32
    %6 = vector.broadcast %cst_3 : f32 to vector<8x128xf32>
    %7 = arith.maximumf %0, %6 : vector<8x128xf32>
    %8 = arith.mulf %0, %1 : vector<8x128xf32>
    %9 = arith.subf %7, %8 : vector<8x128xf32>
    %10 = math.log1p %5 : vector<8x128xf32>
    %11 = arith.addf %9, %10 : vector<8x128xf32>
    %cst_4 = arith.constant 1.000000e+00 : f32
    %12 = vector.broadcast %cst_4 : f32 to vector<8x128xf32>
    %13 = arith.addf %12, %5 : vector<8x128xf32>
    %14 = tpu.reciprocal %13 {approx = true} : vector<8x128xf32> -> vector<8x128xf32>
    %cst_5 = arith.constant 0.000000e+00 : f32
    %15 = vector.broadcast %cst_5 : f32 to vector<8x128xf32>
    %16 = arith.cmpf oge, %0, %15 : vector<8x128xf32>
    %17 = arith.mulf %5, %14 : vector<8x128xf32>
    %18 = arith.select %16, %14, %17 : vector<8x128xi1>, vector<8x128xf32>
    %19 = arith.mulf %1, %18 : vector<8x128xf32>
    %20 = arith.addf %1, %18 : vector<8x128xf32>
    %21 = arith.addf %19, %19 : vector<8x128xf32>
    %22 = arith.subf %20, %21 : vector<8x128xf32>
    %23 = arith.mulf %22, %22 : vector<8x128xf32>
    %cst_6 = arith.constant -5.000000e-01 : f32
    %24 = vector.broadcast %cst_6 : f32 to vector<8x128xf32>
    %25 = arith.mulf %1, %24 : vector<8x128xf32>
    %cst_7 = arith.constant 7.500000e-01 : f32
    %26 = vector.broadcast %cst_7 : f32 to vector<8x128xf32>
    %27 = arith.addf %26, %25 : vector<8x128xf32>
    %28 = arith.mulf %27, %23 : vector<8x128xf32>
    %29 = arith.mulf %28, %11 : vector<8x128xf32>
    %30 = vector.shape_cast %29 : vector<8x128xf32> to vector<1x8x128xf32>
    %cst_8 = arith.constant dense<0.000000e+00> : vector<8x128xf32>
    %31 = vector.multi_reduction <add>, %30, %cst_8 [0] : vector<1x8x128xf32> to vector<8x128xf32>
    %c0_9 = arith.constant 0 : index
    %c0_10 = arith.constant 0 : index
    %32 = vector.load %arg3[%c0_9, %c0_10] : memref<8x128xf32, #tpu.memory_space<vmem>>, vector<8x128xf32>
    tpu.vector_store %arg3[%c0_9, %c0_10], %31 {strides = array<i32>} : memref<8x128xf32, #tpu.memory_space<vmem>>, vector<8x128xf32>,
    return
  }
  func.func @transform_0(%arg0: i32) -> (i32, i32) {
    %c0_i32 = arith.constant 0 : i32
    %c0_i32_0 = arith.constant 0 : i32
    return %arg0, %c0_i32 : i32, i32
  }
  func.func @transform_1(%arg0: i32) -> (i32, i32) {
    %c0_i32 = arith.constant 0 : i32
    %c0_i32_0 = arith.constant 0 : i32
    return %arg0, %c0_i32 : i32, i32
  }
  func.func @transform_2(%arg0: i32) -> (i32, i32) {
    %c0_i32 = arith.constant 0 : i32
    %c0_i32_0 = arith.constant 0 : i32
    return %arg0, %c0_i32 : i32, i32
  }
}

</mosaic_0001>

<bundles_post_ra>
// kernel: tpu_custom_call.1
= control target key start
LH: loop header
LB: loop body
LE: loop exit
PB: predicated region body
PF: predicated region fallthrough
CT: control target
= control target key end

     0   :  { %7 = vsyncpa [#allocation3], 0  ;;  %s774_s0 = inlined_call_operand.hbm [shape: f32[16,128], index: 0, kind: input, shape index: {}]   ;;  %s775_s1 = inlined_call_operand.hbm [shape: f32[16,128], index: 1, kind: input, shape index: {}]   ;;  %s776_s2 = inlined_call_operand.hbm [shape: f32[16,128], index: 2, kind: output, shape index: {}]  }
   0x1   :  { %9 = vsyncpa [#allocation3 + $0x1], 0 }
   0x2   :  { %10 = vsyncpa [#allocation6], 0 }
   0x3   :  { %12 = vsyncpa [#allocation6 + $0x1], 0 }
   0x4   :  { %13 = vsyncpa [#allocation4], 0 }
   0x5   :  { %15 = vsyncpa [#allocation4 + $0x1], 0  ;;  %s560_s9 = smov 0   ;;  %s562_s10 = smov 0  }
   0x6   :  { %s564_s11 = smov 0   ;;  %s566_s12 = smov 0  }
   0x7 LB: > { %s581_s13 = sadd.s32 4294967295, %s540_s12   ;;  %s338_s14 = sadd.s32 4294967294, %s540_s12   ;;  %s540_s12 = sphi %s566_s12, %s795_s12   ;;  %s536_s11 = sphi %s564_s11, %s794_s11   ;;  %s532_s10 = sphi %s562_s10, %s793_s10   ;;  %s528_s9 = sphi %s560_s9, %s792_s9  }
   0x8   : > { %s585_s15 = sadd.s32 1, %s540_s12   ;;  %s28_s16 = sadd.s32 1, %s536_s11 }
   0x9   : > { %s25_s17 = ssub.s32 %s540_s12, %s585_s15  ;;  %p35_p0 = scmp.ne.s32.totalorder %s536_s11, %s532_s10 }
   0xa   : > { %p26_p1 = scmp.eq.s32.totalorder %s25_s17, 0  ;;  %p36_p2 = scmp.eq.s32.totalorder %s540_s12, 0 }
   0xb   : > { %p41_p3 = scmp.ne.s32.totalorder %s532_s10, %s528_s9  ;;  %p42_p4 = scmp.eq.s32.totalorder %s581_s13, 0 }
   0xc   : > { %s597_s18 = scalar_select %p26_p1, %s536_s11, %s28_s16  }
   0xd   : > { %p599_p5 = por %p36_p2, %p35_p0  ;;  %p603_p6 = por %p42_p4, %p41_p3 }
   0xe   : > { %p91_p7 = scmp.eq.s32.totalorder %s581_s13, 1  ;;  %p97_p8 = scmp.eq.s32.totalorder %s338_s14, 1 }
   0xf   : > { %s780_s20 = scalar_select %p603_p6, 1, 0 }
  0x10   : > { %p370_p10 = scmp.lt.s32.totalorder %s540_s12, 2  ;;  %p610_p11 = por %p91_p7, %p35_p0 }
  0x11   : > { %p614_p12 = por %p97_p8, %p41_p3  ;;  %s619_s23 = sand.u32 1, %s536_s11  }
  0x12   : > { %s781_s21 = scalar_select %p610_p11, 1, 0 }
  0x13   : > { %s782_s22 = scalar_select %p614_p12, 1, 0 }
  0x14   : > { %s342_s24 = sshll.u32 %s540_s12, 7  ;;  %s341_s25 = sshll.u32 %s619_s23, 3 }
  0x15   : > { %s628_s28 = scalar_lea.hbm %s774_s0, %s342_s24  ;;  %s121_s29 = scalar_lea.vmem [#allocation2], %s341_s25 }
  0x16   : > { %s128_s30 = sshll.u32 %s121_s29, 4  ;;  %p634_p13 = pnand %p370_p10, %p599_p5  ;;  %s638_s30 = int_to_ptr.vmem [resolvable:$true] %s128_s30 }
  0x17   : > { %s118_s4 = scalar_lea.sflag [#allocation3], %s619_s23  ;;  %s410_s5 = scalar_lea.hbm %s628_s28, 128 }
  0x18   : > { %p411_p2 = scmp.ne.s32.totalorder %s628_s28, %s410_s5  ;;  %p412_p3 = pneg %p634_p13 }
  0x19   : > { %s415_s8 = scalar_lea.hbm %s774_s0, 256  ;;  %p416_p5 = scmp.lt.u32.totalorder %s628_s28, %s774_s0 }
  0x1a   : > { %p413_p4 = pnand %p412_p3, %p411_p2  ;;  %p417_p8 = scmp.lt.u32.totalorder %s415_s8, %s410_s5 }
  0x1b   : > { %p419_p9 = scmp.lt.u32.totalorder %s410_s5, %s628_s28 }
  0x1c   : > { %p414_p7 = pneg %p413_p4  ;;  %p418_p10 = por %p417_p8, %p416_p5 }
  0x1e   : > { %p420_p0 = por %p419_p9, %p418_p10 }
  0x20   : > { %p421_p1 = pnand %p420_p0, %p414_p7 }
  0x22   : > { %424 = shalt.err (!%p421_p1)
}
  0x23   : > { %s425_s17 = scalar_lea.vmem %s638_s30, 128  ;;  %s542_s19 = smov [#allocation2]  }
  0x24   : > { %p426_p2 = scmp.ne.s32.totalorder %s638_s30, %s425_s17  ;;  %s430_s26 = sshll.u32 %s542_s19, 4  ;;  %s431_s26 = int_to_ptr.vmem [resolvable:$false] %s430_s26 }
  0x25   : > { %s432_s27 = scalar_lea.vmem %s431_s26, 256  ;;  %p433_p11 = scmp.lt.s32.totalorder %s638_s30, %s431_s26 }
  0x26   : > { %p428_p4 = pnand %p426_p2, %p412_p3  ;;  %p434_p5 = scmp.lt.s32.totalorder %s432_s27, %s425_s17 }
  0x28   : > { %p429_p12 = pneg %p428_p4  ;;  %p435_p8 = por %p434_p5, %p433_p11 }
  0x2a   : > { %p436_p9 = pnand %p435_p8, %p429_p12 }
  0x2c   : > { %439 = shalt.err (!%p436_p9)
}
  0x2d   : > { %362 = dma.hbm_to_vmem [thread:$0]  (!%p634_p13), %s628_s28, 128, %s638_s30, %s118_s4  }
  0x2e   : > { %p784_p0 = scmp.lt.s32.totalorder %s540_s12, 3  ;;  %p785_p1 = scmp.ge.s32.totalorder %s540_s12, 1 }
  0x2f   : > { %s681_s7 = scalar_lea.hbm %s775_s1, %s342_s24  ;;  %s139_s8 = scalar_lea.vmem [#allocation5], %s341_s25 }
  0x30   : > { %p672_p7 = pnand %p785_p1, %p784_p0  ;;  %s146_s14 = sshll.u32 %s139_s8, 4  ;;  %s147_s14 = int_to_ptr.vmem [resolvable:$true] %s146_s14 }
  0x31   : > { %s136_s28 = scalar_lea.sflag [#allocation6], %s619_s23  ;;  %s440_s30 = scalar_lea.hbm %s681_s7, 128 }
  0x32   : > { %s786_s29 = scalar_select %p672_p7, 1, 0 }
  0x33   : > { %p441_p11 = scmp.ne.s32.totalorder %s681_s7, %s440_s30  ;;  %s445_s24 = scalar_lea.hbm %s775_s1, 256 }
  0x34   : > { %p446_p2 = scmp.lt.u32.totalorder %s681_s7, %s775_s1  ;;  %p447_p4 = scmp.lt.u32.totalorder %s445_s24, %s440_s30 }
  0x35   : > { %p443_p12 = pnand %p441_p11, %p412_p3  ;;  %p449_p8 = scmp.lt.u32.totalorder %s440_s30, %s681_s7 }
  0x36   : > { %p448_p5 = por %p447_p4, %p446_p2 }
  0x37   : > { %p444_p10 = pneg %p443_p12 }
  0x38   : > { %p450_p9 = por %p449_p8, %p448_p5 }
  0x3a   : > { %p451_p0 = pnand %p450_p9, %p444_p10 }
  0x3c   : > { %454 = shalt.err (!%p451_p0)
}
  0x3d   : > { %s455_s23 = scalar_lea.vmem %s147_s14, 128  ;;  %s543_s25 = smov [#allocation5]  }
  0x3e   : > { %p456_p1 = scmp.ne.s32.totalorder %s147_s14, %s455_s23  ;;  %s460_s26 = sshll.u32 %s543_s25, 4  ;;  %s461_s26 = int_to_ptr.vmem [resolvable:$false] %s460_s26 }
  0x3f   : > { %s462_s27 = scalar_lea.vmem %s461_s26, 256  ;;  %p463_p6 = scmp.lt.s32.totalorder %s147_s14, %s461_s26 }
  0x40   : > { %p458_p11 = pnand %p456_p1, %p412_p3  ;;  %p464_p7 = scmp.lt.s32.totalorder %s462_s27, %s455_s23 }
  0x42   : > { %p459_p12 = pneg %p458_p11  ;;  %p465_p2 = por %p464_p7, %p463_p6 }
  0x44   : > { %p466_p4 = pnand %p465_p2, %p459_p12 }
  0x46   : > { %469 = shalt.err (!%p466_p4)
}
  0x47   : > { %365 = dma.hbm_to_vmem [thread:$0]  (!%p634_p13), %s681_s7, 128, %s147_s14, %s136_s28  }
  0x48   : > { %p787_p10 = scmp.ne.s32.totalorder %s786_s29, 0 }
  0x49   : > { %s708_s5 = sand.u32 (!%p787_p10), 1, %s532_s10   ;;  %p788_p6 = scmp.ne.s32.totalorder (!%p787_p10), %s780_s20, 0 }
  0x4a   : > { %155 = sbr.rel (%p787_p10) target bundleno = 145 (0x91), region = 28  ;;  %s711_s6 = sshll.u32 (!%p787_p10), %s708_s5, 3 }
  0x4b   : > { %s158_s8 = scalar_lea.sflag (!%p787_p10), [#allocation3], %s708_s5  ;;  %s161_s30 = scalar_lea.vmem (!%p787_p10), [#allocation2], %s711_s6 }
  0x51   : > { %515 = dma.done.wait (%p788_p6), %s158_s8, 128  }
  0x52   : > { %517 = vsyncadd (%p788_p6), %s158_s8, 4294967168  ;;  %s167_s3 = scalar_lea.sflag [#allocation6], %s708_s5  ;;  %s170_s29 = scalar_lea.vmem [#allocation5], %s711_s6 }
  0x53   : > { %519 = dma.done.wait (%p788_p6), %s167_s3, 128  }
  0x54   : > { %521 = vsyncadd (%p788_p6), %s167_s3, 4294967168  ;;  %v196_v0 = vld [vmem:[%s161_s30] sm:$0xff]  ;;  %v197_v11 = vld [vmem:[%s170_s29] sm:$0xff]  ;;  %s195_s20 = scalar_lea.vmem [#allocation7], %s711_s6  ;;  %s350_s14 = sshll.u32 %s581_s13, 7 }
  0x55   : > { %v198_v1 = vand.u32 2147483647, %v196_v0  ;;  %vm217_vm0 = vcmp.ge.f32.partialorder %v196_v0, 0.0  ;;  %v202_v13 = vmax.f32 %v196_v0, 0.0  ;;  %v203_v14 = vmul.f32 %v197_v11, %v196_v0  ;;  %s245_s7 = sshll.u32 %s195_s20, 4  ;;  %s732_s16 = scalar_lea.hbm %s776_s2, %s350_s14  ;;  %s727_s7 = int_to_ptr.vmem [resolvable:$true] %s245_s7 }
  0x56   : > { %v225_v20 = vmul.f32 -0.5, %v197_v11  ;;  %s232_s24 = scalar_lea.sflag [#allocation4], %s708_s5  ;;  %s470_s17 = scalar_lea.vmem %s727_s7, 128 }
  0x57   : > { %v199_v2 = vsub.f32 0.0, %v198_v1  ;;  %v204_v21 = vsub.f32 %v202_v13, %v203_v14  ;;  %p471_p13 = scmp.ne.s32.totalorder %s727_s7, %s470_s17  ;;  %p789_p3 = scmp.ne.s32.totalorder %s781_s21, 0 }
  0x58   : > { %v226_v25 = vadd.f32 0.75, %v225_v20  ;;  %s544_s13 = smov [#allocation7]  }
  0x59   : > { %v200_v3 = vmul.f32 1.442695, %v199_v2  ;;  %p472_p7 = pnand %p471_p13, %p789_p3  ;;  %s474_s19 = sshll.u32 %s544_s13, 4  ;;  %s475_s19 = int_to_ptr.vmem [resolvable:$false] %s474_s19 }
  0x5a   : > { %s476_s23 = scalar_lea.vmem %s475_s19, 256  ;;  %p477_p8 = scmp.lt.s32.totalorder %s727_s7, %s475_s19 }
  0x5b   : > { %404 = vpow2.f32 %v200_v3  ;;  %p473_p5 = pneg %p472_p7  ;;  %p478_p9 = scmp.lt.s32.totalorder %s476_s23, %s470_s17 }
  0x5d   : > { %p479_p0 = por %p478_p9, %p477_p8 }
  0x5f   : > { %p480_p1 = pnand %p479_p0, %p473_p5 }
  0x65   : > { %v405_v4 = vpop.eup %404 }
  0x66   : > { %v205_v5 = vadd.f32 1.0, %v405_v4  ;;  %v208_v6 = vmul.f32 -0.5, %v405_v4  ;;  %v211_v10 = vand.u32 2147483647, %v405_v4 }
  0x68   : > { %406 = vlog2.f32 %v205_v5  ;;  %v209_v8 = vadd.f32 1.0, %v208_v6  ;;  %vm212_vm1 = vcmp.lt.f32.partialorder %v211_v10, 0.0004427343 }
  0x69   : > { %408 = vrcp.f32 %v205_v5 }
  0x6a   : > { %v210_v16 = vmul.f32 %v405_v4, %v209_v8 }
  0x72   : > { %v407_v7 = vpop.eup %406 }
  0x73   : > { %v409_v9 = vpop.eup %408  ;;  %v207_v15 = vmul.f32 0.6931472, %v407_v7 }
  0x74   : > { %v218_v12 = vmul.f32 %v409_v9, %v405_v4 }
  0x75   : > { %v213_v23 = vsel %vm212_vm1, %v210_v16, %v207_v15 }
  0x76   : > { %v219_v17 = vsel %vm217_vm0, %v409_v9, %v218_v12  ;;  %v214_v26 = vadd.f32 %v213_v23, %v204_v21 }
  0x77   : > { %v220_v18 = vmul.f32 %v219_v17, %v197_v11  ;;  %v221_v19 = vadd.f32 %v219_v17, %v197_v11 }
  0x79   : > { %v222_v22 = vadd.f32 %v220_v18, %v220_v18 }
  0x7b   : > { %v223_v24 = vsub.f32 %v221_v19, %v222_v22 }
  0x7d   : > { %v224_v27 = vmul.f32 %v223_v24, %v223_v24 }
  0x7f   : > { %v227_v28 = vmul.f32 %v226_v25, %v224_v27 }
  0x81   : > { %v228_v29 = vmul.f32 %v227_v28, %v214_v26 }
  0x83   : > { %230 = vst [vmem:[%s195_s20] sm:$0xff] %v228_v29 }
  0x84   : > { %483 = shalt.err (!%p480_p1)
}
  0x85   : > { %s484_s25 = scalar_lea.hbm %s732_s16, 128  ;;  %s488_s5 = scalar_lea.hbm %s776_s2, 256 }
  0x86   : > { %p485_p11 = scmp.ne.s32.totalorder %s732_s16, %s484_s25  ;;  %p489_p4 = scmp.lt.u32.totalorder %s732_s16, %s776_s2 }
  0x87   : > { %p490_p10 = scmp.lt.u32.totalorder %s488_s5, %s484_s25  ;;  %p492_p13 = scmp.lt.u32.totalorder %s484_s25, %s732_s16 }
  0x88   : > { %p486_p12 = pnand %p485_p11, %p789_p3 }
  0x89   : > { %p491_p6 = por %p490_p10, %p489_p4 }
  0x8a   : > { %p487_p2 = pneg %p486_p12 }
  0x8b   : > { %p493_p7 = por %p492_p13, %p491_p6 }
  0x8d   : > { %p494_p5 = pnand %p493_p7, %p487_p2 }
  0x8f   : > { %497 = shalt.err (!%p494_p5)
}
  0x90   : > { %357 = dma.vmem_to_hbm [thread:$0]  (%p789_p3), %s727_s7, 128, %s732_s16, %s232_s24  }
  0x91 PF: > { %s257_s30 = sand.u32 1, %s528_s9   ;;  %p790_p8 = scmp.ne.s32.totalorder %s782_s22, 0 }
  0x92   : > { %p791_p9 = scmp.ge.s32.totalorder %s540_s12, 2  ;;  %s258_s3 = scalar_lea.sflag [#allocation4], %s257_s30 }
  0x94   : > { %p367_p0 = pnand %p791_p9, %p790_p8 }
  0x96   : > { %523 = dma.done.wait (!%p367_p0), %s258_s3, 128  }
  0x97   : > { %525 = vsyncadd (!%p367_p0), %s258_s3, 4294967168  ;;  %p18_p1 = scmp.ge.s32.totalorder %s585_s15, 4   ;;  %s792_s9 = smov %s532_s10 }
  0x98   : > { %s793_s10 = smov %s536_s11  ;;  %s794_s11 = smov %s597_s18 }
  0x99   : > { %s795_s12 = smov %s585_s15  ;;  %20 = sbr.rel (!%p18_p1) target bundleno = 7 (0x7), region = 86 }
  0xa0   :  { %263 = vsyncpa [#allocation3], 1 }
  0xa1   :  { %265 = vsyncpa [#allocation3 + $0x1], 1 }
  0xa2   :  { %266 = vsyncpa [#allocation6], 1 }
  0xa3   :  { %268 = vsyncpa [#allocation6 + $0x1], 1 }
  0xa4   :  { %269 = vsyncpa [#allocation4], 1 }
  0xa5   :  { %271 = vsyncpa [#allocation4 + $0x1], 1 }

</bundles_post_ra>
